<compile_context>
chip_gen: v6e
topology: v6e:2x2x1
jax: 0.10.0
libtpu: 0.0.40
codegen_flags: <defaults>
</compile_context>

<pallas_src>
import functools
import math

import jax
import jax.numpy as jnp
from jax import lax
from jax.experimental import pallas as pl
from jax.experimental.pallas import tpu as pltpu


def _pick_tile(dim, preferred):
    """Use `preferred` if it divides `dim` exactly, else fall back to the full dim."""
    return preferred if dim % preferred == 0 else dim


# ---------------------------------------------------------------------------
# Fully fused MHA kernel (self-attention): one batch per grid step.
#   x_ref    : (S, D)   activations for one batch
#   wqkv_ref : (D, 3D)  fused, pre-transposed Q|K|V weights
#   bqkv_ref : (1, 3D)  fused bias
#   wo_ref   : (D, D)   pre-transposed output-projection weight
#   bo_ref   : (1, D)   output bias
#   o_ref    : (S, D)   final output for one batch
#   ctx_ref  : (S, D)   fp32 VMEM scratch holding the merged-head context
# ---------------------------------------------------------------------------
def fused_mha_kernel(x_ref, wqkv_ref, bqkv_ref, wo_ref, bo_ref, o_ref, ctx_ref,
                     *, num_heads, d_k):
    D = num_heads * d_k
    scale = 1.0 / math.sqrt(d_k)

    x = x_ref[...]                                           # (S, D)
    mm_dtype = x.dtype

    # Fused QKV projection, fp32 accumulate.
    qkv = (jnp.dot(x, wqkv_ref[...], preferred_element_type=jnp.float32)
           + bqkv_ref[...].astype(jnp.float32))              # (S, 3D)
    qkv = qkv.astype(mm_dtype)

    # Per-head scaled-dot-product attention (static unroll: heads are few).
    for head in range(num_heads):
        off = head * d_k
        q = qkv[:, off:off + d_k]                            # (S, d_k)
        k = qkv[:, D + off:D + off + d_k]                    # (S, d_k)
        v = qkv[:, 2 * D + off:2 * D + off + d_k]            # (S, d_k)

        # scores = q @ k^T / sqrt(d_k) (contraction on d_k, no transpose op)
        s = lax.dot_general(q, k, (((1,), (1,)), ((), ())),
                            preferred_element_type=jnp.float32) * scale
        s = s - jnp.max(s, axis=-1, keepdims=True)
        e = jnp.exp(s)
        p = e * pl.reciprocal(jnp.sum(e, axis=-1, keepdims=True), approx=True)

        ctx_ref[:, off:off + d_k] = jnp.dot(p.astype(mm_dtype), v,
                                            preferred_element_type=jnp.float32)

    # Output projection: one full-width GEMM + bias, single lane-dense store.
    out = (jnp.dot(ctx_ref[...].astype(mm_dtype), wo_ref[...],
                   preferred_element_type=jnp.float32)
           + bo_ref[...].astype(jnp.float32))
    o_ref[...] = out.astype(o_ref.dtype)


def _fused_vmem_bytes(S, D, itemsize):
    """Rough per-step VMEM footprint of the fused kernel (conservative)."""
    weights = 2 * (D * 3 * D + D * D + 4 * D) * itemsize     # double-buffered worst case
    io = 4 * S * D * itemsize                                 # x + out, double-buffered
    scratch = S * D * 4                                       # fp32 ctx scratch
    interm = S * 3 * D * (4 + itemsize) + 3 * S * S * 4 + 2 * S * D * 4
    return weights + io + scratch + interm


def fused_mha(x, w_qkv_t, b_qkv, wo_t, bo, num_heads, *, out_dtype):
    """x: (B, S, D) -> (B, S, D).  Whole MHA in a single kernel per batch."""
    B, S, D = x.shape
    d_k = D // num_heads
    kernel = functools.partial(fused_mha_kernel, num_heads=num_heads, d_k=d_k)
    return pl.pallas_call(
        kernel,
        out_shape=jax.ShapeDtypeStruct((B, S, D), out_dtype),
        grid=(B,),
        in_specs=[
            pl.BlockSpec((None, S, D), lambda b: (b, 0, 0)),
            pl.BlockSpec((D, 3 * D), lambda b: (0, 0)),
            pl.BlockSpec((1, 3 * D), lambda b: (0, 0)),
            pl.BlockSpec((D, D), lambda b: (0, 0)),
            pl.BlockSpec((1, D), lambda b: (0, 0)),
        ],
        out_specs=pl.BlockSpec((None, S, D), lambda b: (b, 0, 0)),
        scratch_shapes=[pltpu.VMEM((S, D), jnp.float32)],
        compiler_params=pltpu.CompilerParams(
            dimension_semantics=("parallel",)),
    )(x, w_qkv_t, b_qkv.reshape(1, 3 * D), wo_t, bo.reshape(1, D))


# ---------------------------------------------------------------------------
# Fallback path pieces (long sequences / cross-attention):
#   tiled linear GEMM + per-batch attention kernel.
# ---------------------------------------------------------------------------
def linear_kernel(x_ref, wt_ref, b_ref, o_ref, acc_ref):
    k = pl.program_id(2)

    @pl.when(k == 0)
    def _():
        acc_ref[...] = jnp.zeros_like(acc_ref)

    acc_ref[...] += jnp.dot(x_ref[...], wt_ref[...],
                            preferred_element_type=jnp.float32)

    @pl.when(k == pl.num_programs(2) - 1)
    def _():
        o_ref[...] = (acc_ref[...] + b_ref[...].astype(jnp.float32)
                      ).astype(o_ref.dtype)


def linear(x, w_t, b, *, out_dtype=None, tm=256, tn=256, tk=512):
    """x: (M, K), w_t: (K, N) (already transposed), b: (N,) -> (M, N)."""
    M, K = x.shape
    N = w_t.shape[1]
    out_dtype = out_dtype or x.dtype
    tm, tn, tk = _pick_tile(M, tm), _pick_tile(N, tn), _pick_tile(K, tk)
    return pl.pallas_call(
        linear_kernel,
        out_shape=jax.ShapeDtypeStruct((M, N), out_dtype),
        grid=(M // tm, N // tn, K // tk),
        in_specs=[
            pl.BlockSpec((tm, tk), lambda i, j, k: (i, k)),
            pl.BlockSpec((tk, tn), lambda i, j, k: (k, j)),
            pl.BlockSpec((1, tn), lambda i, j, k: (0, j)),
        ],
        out_specs=pl.BlockSpec((tm, tn), lambda i, j, k: (i, j)),
        scratch_shapes=[pltpu.VMEM((tm, tn), jnp.float32)],
        compiler_params=pltpu.CompilerParams(
            dimension_semantics=("parallel", "parallel", "arbitrary")),
    )(x, w_t, b.reshape(1, N))


def attention_kernel(q_ref, k_ref, v_ref, o_ref, *, num_heads, d_k):
    """One batch: q (Sq, D), k/v (Sk, D) -> merged-head context (Sq, D)."""
    scale = 1.0 / math.sqrt(d_k)
    q = q_ref[...]
    k = k_ref[...]
    v = v_ref[...]

    ctxs = []
    for head in range(num_heads):
        off = head * d_k
        qh = q[:, off:off + d_k]
        kh = k[:, off:off + d_k]
        vh = v[:, off:off + d_k]

        s = lax.dot_general(qh, kh, (((1,), (1,)), ((), ())),
                            preferred_element_type=jnp.float32) * scale
        s = s - jnp.max(s, axis=-1, keepdims=True)
        e = jnp.exp(s)
        p = e * pl.reciprocal(jnp.sum(e, axis=-1, keepdims=True), approx=True)
        ctxs.append(jnp.dot(p.astype(q.dtype), vh,
                            preferred_element_type=jnp.float32))

    o_ref[...] = jnp.concatenate(ctxs, axis=-1).astype(o_ref.dtype)


def attention(q, k, v, num_heads, d_k, out_dtype):
    """q: (B, Sq, D), k/v: (B, Sk, D) -> (B, Sq, D) merged-head context."""
    B, Sq, D = q.shape
    Sk = k.shape[1]
    kernel = functools.partial(attention_kernel, num_heads=num_heads, d_k=d_k)
    return pl.pallas_call(
        kernel,
        out_shape=jax.ShapeDtypeStruct((B, Sq, D), out_dtype),
        grid=(B,),
        in_specs=[
            pl.BlockSpec((None, Sq, D), lambda b: (b, 0, 0)),
            pl.BlockSpec((None, Sk, D), lambda b: (b, 0, 0)),
            pl.BlockSpec((None, Sk, D), lambda b: (b, 0, 0)),
        ],
        out_specs=pl.BlockSpec((None, Sq, D), lambda b: (b, 0, 0)),
        compiler_params=pltpu.CompilerParams(
            dimension_semantics=("parallel",)),
    )(q, k, v)


# ---------------------------------------------------------------------------
# MultiHeadAttention forward (glue in plain JAX, hot path in Pallas kernels)
# ---------------------------------------------------------------------------
def prepare_params(raw, dtype=None):
    """Pre-transpose / fuse the nn.Linear weights once (params are static)."""
    dtype = dtype or raw["wq"].dtype
    w_qkv_t = jnp.concatenate(
        [raw["wq"], raw["wk"], raw["wv"]], axis=0).T.astype(dtype)       # (D, 3D)
    b_qkv = jnp.concatenate([raw["bq"], raw["bk"], raw["bv"]]).astype(dtype)
    return {
        "w_qkv_t": w_qkv_t, "b_qkv": b_qkv,
        "wq_t": raw["wq"].T.astype(dtype), "bq": raw["bq"].astype(dtype),
        "wk_t": raw["wk"].T.astype(dtype), "bk": raw["bk"].astype(dtype),
        "wv_t": raw["wv"].T.astype(dtype), "bv": raw["bv"].astype(dtype),
        "wo_t": raw["wo"].T.astype(dtype), "bo": raw["bo"].astype(dtype),
    }


# Keep the fused kernel comfortably under the default scoped-VMEM limit.
_FUSED_VMEM_BUDGET = 20 * 1024 * 1024


def multi_head_attention(query, key, value, params, h, *, matmul_dtype=None):
    """query/key/value: (B, S, D). Returns (B, S, D). Eval mode, mask=None."""
    B, S, D = query.shape
    d_k = D // h
    out_dtype = query.dtype
    cast = (lambda a: a.astype(matmul_dtype)) if matmul_dtype else (lambda a: a)

    self_attn = (query is key) and (key is value)
    itemsize = jnp.dtype(matmul_dtype or query.dtype).itemsize

    if self_attn and _fused_vmem_bytes(S, D, itemsize) <= _FUSED_VMEM_BUDGET:
        # Single fully fused kernel: QKV proj + attention + output proj.
        return fused_mha(cast(query), cast(params["w_qkv_t"]), cast(params["b_qkv"]),
                         cast(params["wo_t"]), cast(params["bo"]), h,
                         out_dtype=out_dtype)

    # Fallback / cross-attention path: tiled GEMMs + per-batch attention kernel.
    if self_attn:
        x = cast(query).reshape(B * S, D)
        qkv = linear(x, cast(params["w_qkv_t"]), cast(params["b_qkv"])).reshape(B, S, 3 * D)
        q, k, v = qkv[..., :D], qkv[..., D:2 * D], qkv[..., 2 * D:]
    else:
        q = linear(cast(query).reshape(B * S, D), cast(params["wq_t"]),
                   cast(params["bq"])).reshape(B, S, D)
        Sk = key.shape[1]
        k = linear(cast(key).reshape(B * Sk, D), cast(params["wk_t"]),
                   cast(params["bk"])).reshape(B, Sk, D)
        v = linear(cast(value).reshape(B * Sk, D), cast(params["wv_t"]),
                   cast(params["bv"])).reshape(B, Sk, D)

    ctx = attention(q, k, v, h, d_k, q.dtype)                    # (B, S, D)
    out = linear(ctx.reshape(B * S, D), cast(params["wo_t"]), cast(params["bo"]),
                 out_dtype=out_dtype)
    return out.reshape(B, S, D)


# ---------------------------------------------------------------------------
# Deterministic parameter init (shapes/layout of nn.Linear(d_model, d_model))
# ---------------------------------------------------------------------------
def init_params(key, d_model):
    keys = jax.random.split(key, 8)
    scale = 1.0 / math.sqrt(d_model)

    def w(k):
        return jax.random.uniform(k, (d_model, d_model), jnp.float32, -scale, scale)

    def b(k):
        return jax.random.uniform(k, (d_model,), jnp.float32, -scale, scale)

    return {
        "wq": w(keys[0]), "bq": b(keys[1]),
        "wk": w(keys[2]), "bk": b(keys[3]),
        "wv": w(keys[4]), "bv": b(keys[5]),
        "wo": w(keys[6]), "bo": b(keys[7]),
    }


# Pure-JAX reference (mirrors the PyTorch module, eval mode, mask=None)
def reference_mha(query, key, value, raw, h):
    B, S, D = query.shape
    d_k = D // h
    hi = lax.Precision.HIGHEST

    def lin(x, w, b):
        return jnp.einsum("bsd,od->bso", x, w, precision=hi) + b

    q = lin(query, raw["wq"], raw["bq"]).reshape(B, S, h, d_k).transpose(0, 2, 1, 3)
    k = lin(key,   raw["wk"], raw["bk"]).reshape(B, S, h, d_k).transpose(0, 2, 1, 3)
    v = lin(value, raw["wv"], raw["bv"]).reshape(B, S, h, d_k).transpose(0, 2, 1, 3)
    s = jnp.einsum("bhqd,bhkd->bhqk", q, k, precision=hi) / math.sqrt(d_k)
    p = jax.nn.softmax(s, axis=-1)
    ctx = jnp.einsum("bhqk,bhkd->bhqd", p, v, precision=hi)
    ctx = ctx.transpose(0, 2, 1, 3).reshape(B, S, D)
    return lin(ctx, raw["wo"], raw["bo"])


if __name__ == "__main__":
    B, S, d_model, h = 2, 8, 32, 4   # small shapes consistent with the module

    root = jax.random.PRNGKey(0)
    k_params, k_x = jax.random.split(root, 2)
    raw = init_params(k_params, d_model)
    params = prepare_params(raw)

    x = jax.random.normal(k_x, (B, S, d_model), jnp.float32)

    # Encoder self-attention: query = key = value (exercises the fully fused kernel).
    out = multi_head_attention(x, x, x, params, h)
    jax.block_until_ready(out)
    assert out.shape == (B, S, d_model)

    ref = reference_mha(x, x, x, raw, h)
    max_err = float(jnp.max(jnp.abs(out - ref)))
    assert max_err < 5e-2, f"mismatch vs reference: {max_err}"

    # Also exercise the fallback (separate q/k/v) path once for coverage.
    out2 = multi_head_attention(x, x + 0.0, x + 0.0, params, h)
    jax.block_until_ready(out2)
    max_err2 = float(jnp.max(jnp.abs(out2 - ref)))
    assert max_err2 < 5e-2, f"fallback mismatch vs reference: {max_err2}"

    print("KERNEL_OK")
</pallas_src>

<mosaic_0001>
module attributes {stable_mosaic.version = 11 : i64} {
  func.func @fused_mha_kernel(%arg0: i32, %arg1: memref<1x8x32xf32, #tpu.memory_space<vmem>>, %arg2: memref<32x96xf32, #tpu.memory_space<vmem>>, %arg3: memref<1x96xf32, #tpu.memory_space<vmem>>, %arg4: memref<32x32xf32, #tpu.memory_space<vmem>>, %arg5: memref<1x32xf32, #tpu.memory_space<vmem>>, %arg6: memref<1x8x32xf32, #tpu.memory_space<vmem>>, %arg7: memref<8x32xf32, #tpu.memory_space<vmem>>) attributes {dimension_semantics = [#tpu.dimension_semantics<parallel>], iteration_bounds = array<i64: 2>, scalar_prefetch = 0 : i64, scratch_operands = 1 : i64, tpu.core_type = #tpu.core_type<tc>, window_params = [{transform_indices = @transform_0, window_bounds = array<i64: 1, 8, 32>}, {pipeline_mode = #tpu.pipeline_mode<synchronous>, transform_indices = @transform_1, window_bounds = array<i64: 32, 96>}, {pipeline_mode = #tpu.pipeline_mode<synchronous>, transform_indices = @transform_2, window_bounds = array<i64: 1, 96>}, {pipeline_mode = #tpu.pipeline_mode<synchronous>, transform_indices = @transform_3, window_bounds = array<i64: 32, 32>}, {pipeline_mode = #tpu.pipeline_mode<synchronous>, transform_indices = @transform_4, window_bounds = array<i64: 1, 32>}, {transform_indices = @transform_5, window_bounds = array<i64: 1, 8, 32>}]} {
    %c0 = arith.constant 0 : index
    %c0_0 = arith.constant 0 : index
    %c0_1 = arith.constant 0 : index
    %0 = vector.load %arg1[%c0, %c0_0, %c0_1] : memref<1x8x32xf32, #tpu.memory_space<vmem>>, vector<1x8x32xf32>
    %1 = vector.shape_cast %0 : vector<1x8x32xf32> to vector<8x32xf32>
    %c0_2 = arith.constant 0 : index
    %c0_3 = arith.constant 0 : index
    %2 = vector.load %arg2[%c0_2, %c0_3] : memref<32x96xf32, #tpu.memory_space<vmem>>, vector<32x96xf32>
    %cst = arith.constant dense<0.000000e+00> : vector<8x96xf32>
    %3 = tpu.matmul %1, %2, %cst {dimension_numbers = #tpu.dot_dimension_numbers<[1], [0], [0], [1], [0, 0, 1, 1], [], []>} : vector<8x32xf32>, vector<32x96xf32>, vector<8x96xf32> -> vector<8x96xf32>
    %c0_4 = arith.constant 0 : index
    %c0_5 = arith.constant 0 : index
    %4 = vector.load %arg3[%c0_4, %c0_5] : memref<1x96xf32, #tpu.memory_space<vmem>>, vector<1x96xf32>
    %5 = vector.broadcast %4 : vector<1x96xf32> to vector<8x96xf32>
    %6 = arith.addf %3, %5 : vector<8x96xf32>
    %7 = vector.extract_strided_slice %6 {offsets = [0, 0], sizes = [8, 8], strides = [1, 1]} : vector<8x96xf32> to vector<8x8xf32>
    %8 = vector.extract_strided_slice %6 {offsets = [0, 32], sizes = [8, 8], strides = [1, 1]} : vector<8x96xf32> to vector<8x8xf32>
    %9 = vector.extract_strided_slice %6 {offsets = [0, 64], sizes = [8, 8], strides = [1, 1]} : vector<8x96xf32> to vector<8x8xf32>
    %cst_6 = arith.constant dense<0.000000e+00> : vector<8x8xf32>
    %10 = tpu.matmul %7, %8, %cst_6 {dimension_numbers = #tpu.dot_dimension_numbers<[1], [1], [0], [0], [0, 0, 1, 0], [], []>} : vector<8x8xf32>, vector<8x8xf32>, vector<8x8xf32> -> vector<8x8xf32>
    %cst_7 = arith.constant 0.353553385 : f32
    %11 = vector.broadcast %cst_7 : f32 to vector<8x8xf32>
    %12 = arith.mulf %10, %11 : vector<8x8xf32>
    %cst_8 = arith.constant dense<0xFF800000> : vector<8xf32>
    %13 = vector.multi_reduction <maximumf>, %12, %cst_8 [1] : vector<8x8xf32> to vector<8xf32>
    %14 = vector.shape_cast %13 : vector<8xf32> to vector<8x1xf32>
    %15 = vector.broadcast %14 : vector<8x1xf32> to vector<8x8xf32>
    %16 = arith.subf %12, %15 : vector<8x8xf32>
    %17 = math.exp %16 : vector<8x8xf32>
    %cst_9 = arith.constant dense<0.000000e+00> : vector<8xf32>
    %18 = vector.multi_reduction <add>, %17, %cst_9 [1] : vector<8x8xf32> to vector<8xf32>
    %19 = vector.shape_cast %18 : vector<8xf32> to vector<8x1xf32>
    %20 = tpu.reciprocal %19 {approx = true} : vector<8x1xf32> -> vector<8x1xf32>
    %21 = vector.broadcast %20 : vector<8x1xf32> to vector<8x8xf32>
    %22 = arith.mulf %17, %21 : vector<8x8xf32>
    %cst_10 = arith.constant dense<0.000000e+00> : vector<8x8xf32>
    %23 = tpu.matmul %22, %9, %cst_10 {dimension_numbers = #tpu.dot_dimension_numbers<[1], [0], [0], [1], [0, 0, 1, 1], [], []>} : vector<8x8xf32>, vector<8x8xf32>, vector<8x8xf32> -> vector<8x8xf32>
    %c0_11 = arith.constant 0 : index
    %c0_12 = arith.constant 0 : index
    %24 = vector.load %arg7[%c0_11, %c0_12] : memref<8x32xf32, #tpu.memory_space<vmem>>, vector<8x8xf32>
    tpu.vector_store %arg7[%c0_11, %c0_12], %23 {strides = array<i32>} : memref<8x32xf32, #tpu.memory_space<vmem>>, vector<8x8xf32>,
    %25 = vector.extract_strided_slice %6 {offsets = [0, 8], sizes = [8, 8], strides = [1, 1]} : vector<8x96xf32> to vector<8x8xf32>
    %26 = vector.extract_strided_slice %6 {offsets = [0, 40], sizes = [8, 8], strides = [1, 1]} : vector<8x96xf32> to vector<8x8xf32>
    %27 = vector.extract_strided_slice %6 {offsets = [0, 72], sizes = [8, 8], strides = [1, 1]} : vector<8x96xf32> to vector<8x8xf32>
    %cst_13 = arith.constant dense<0.000000e+00> : vector<8x8xf32>
    %28 = tpu.matmul %25, %26, %cst_13 {dimension_numbers = #tpu.dot_dimension_numbers<[1], [1], [0], [0], [0, 0, 1, 0], [], []>} : vector<8x8xf32>, vector<8x8xf32>, vector<8x8xf32> -> vector<8x8xf32>
    %cst_14 = arith.constant 0.353553385 : f32
    %29 = vector.broadcast %cst_14 : f32 to vector<8x8xf32>
    %30 = arith.mulf %28, %29 : vector<8x8xf32>
    %cst_15 = arith.constant dense<0xFF800000> : vector<8xf32>
    %31 = vector.multi_reduction <maximumf>, %30, %cst_15 [1] : vector<8x8xf32> to vector<8xf32>
    %32 = vector.shape_cast %31 : vector<8xf32> to vector<8x1xf32>
    %33 = vector.broadcast %32 : vector<8x1xf32> to vector<8x8xf32>
    %34 = arith.subf %30, %33 : vector<8x8xf32>
    %35 = math.exp %34 : vector<8x8xf32>
    %cst_16 = arith.constant dense<0.000000e+00> : vector<8xf32>
    %36 = vector.multi_reduction <add>, %35, %cst_16 [1] : vector<8x8xf32> to vector<8xf32>
    %37 = vector.shape_cast %36 : vector<8xf32> to vector<8x1xf32>
    %38 = tpu.reciprocal %37 {approx = true} : vector<8x1xf32> -> vector<8x1xf32>
    %39 = vector.broadcast %38 : vector<8x1xf32> to vector<8x8xf32>
    %40 = arith.mulf %35, %39 : vector<8x8xf32>
    %cst_17 = arith.constant dense<0.000000e+00> : vector<8x8xf32>
    %41 = tpu.matmul %40, %27, %cst_17 {dimension_numbers = #tpu.dot_dimension_numbers<[1], [0], [0], [1], [0, 0, 1, 1], [], []>} : vector<8x8xf32>, vector<8x8xf32>, vector<8x8xf32> -> vector<8x8xf32>
    %c0_18 = arith.constant 0 : index
    %c8 = arith.constant 8 : index
    %42 = vector.load %arg7[%c0_18, %c8] : memref<8x32xf32, #tpu.memory_space<vmem>>, vector<8x8xf32>
    tpu.vector_store %arg7[%c0_18, %c8], %41 {strides = array<i32>} : memref<8x32xf32, #tpu.memory_space<vmem>>, vector<8x8xf32>,
    %43 = vector.extract_strided_slice %6 {offsets = [0, 16], sizes = [8, 8], strides = [1, 1]} : vector<8x96xf32> to vector<8x8xf32>
    %44 = vector.extract_strided_slice %6 {offsets = [0, 48], sizes = [8, 8], strides = [1, 1]} : vector<8x96xf32> to vector<8x8xf32>
    %45 = vector.extract_strided_slice %6 {offsets = [0, 80], sizes = [8, 8], strides = [1, 1]} : vector<8x96xf32> to vector<8x8xf32>
    %cst_19 = arith.constant dense<0.000000e+00> : vector<8x8xf32>
    %46 = tpu.matmul %43, %44, %cst_19 {dimension_numbers = #tpu.dot_dimension_numbers<[1], [1], [0], [0], [0, 0, 1, 0], [], []>} : vector<8x8xf32>, vector<8x8xf32>, vector<8x8xf32> -> vector<8x8xf32>
    %cst_20 = arith.constant 0.353553385 : f32
    %47 = vector.broadcast %cst_20 : f32 to vector<8x8xf32>
    %48 = arith.mulf %46, %47 : vector<8x8xf32>
    %cst_21 = arith.constant dense<0xFF800000> : vector<8xf32>
    %49 = vector.multi_reduction <maximumf>, %48, %cst_21 [1] : vector<8x8xf32> to vector<8xf32>
    %50 = vector.shape_cast %49 : vector<8xf32> to vector<8x1xf32>
    %51 = vector.broadcast %50 : vector<8x1xf32> to vector<8x8xf32>
    %52 = arith.subf %48, %51 : vector<8x8xf32>
    %53 = math.exp %52 : vector<8x8xf32>
    %cst_22 = arith.constant dense<0.000000e+00> : vector<8xf32>
    %54 = vector.multi_reduction <add>, %53, %cst_22 [1] : vector<8x8xf32> to vector<8xf32>
    %55 = vector.shape_cast %54 : vector<8xf32> to vector<8x1xf32>
    %56 = tpu.reciprocal %55 {approx = true} : vector<8x1xf32> -> vector<8x1xf32>
    %57 = vector.broadcast %56 : vector<8x1xf32> to vector<8x8xf32>
    %58 = arith.mulf %53, %57 : vector<8x8xf32>
    %cst_23 = arith.constant dense<0.000000e+00> : vector<8x8xf32>
    %59 = tpu.matmul %58, %45, %cst_23 {dimension_numbers = #tpu.dot_dimension_numbers<[1], [0], [0], [1], [0, 0, 1, 1], [], []>} : vector<8x8xf32>, vector<8x8xf32>, vector<8x8xf32> -> vector<8x8xf32>
    %c0_24 = arith.constant 0 : index
    %c16 = arith.constant 16 : index
    %60 = vector.load %arg7[%c0_24, %c16] : memref<8x32xf32, #tpu.memory_space<vmem>>, vector<8x8xf32>
    tpu.vector_store %arg7[%c0_24, %c16], %59 {strides = array<i32>} : memref<8x32xf32, #tpu.memory_space<vmem>>, vector<8x8xf32>,
    %61 = vector.extract_strided_slice %6 {offsets = [0, 24], sizes = [8, 8], strides = [1, 1]} : vector<8x96xf32> to vector<8x8xf32>
    %62 = vector.extract_strided_slice %6 {offsets = [0, 56], sizes = [8, 8], strides = [1, 1]} : vector<8x96xf32> to vector<8x8xf32>
    %63 = vector.extract_strided_slice %6 {offsets = [0, 88], sizes = [8, 8], strides = [1, 1]} : vector<8x96xf32> to vector<8x8xf32>
    %cst_25 = arith.constant dense<0.000000e+00> : vector<8x8xf32>
    %64 = tpu.matmul %61, %62, %cst_25 {dimension_numbers = #tpu.dot_dimension_numbers<[1], [1], [0], [0], [0, 0, 1, 0], [], []>} : vector<8x8xf32>, vector<8x8xf32>, vector<8x8xf32> -> vector<8x8xf32>
    %cst_26 = arith.constant 0.353553385 : f32
    %65 = vector.broadcast %cst_26 : f32 to vector<8x8xf32>
    %66 = arith.mulf %64, %65 : vector<8x8xf32>
    %cst_27 = arith.constant dense<0xFF800000> : vector<8xf32>
    %67 = vector.multi_reduction <maximumf>, %66, %cst_27 [1] : vector<8x8xf32> to vector<8xf32>
    %68 = vector.shape_cast %67 : vector<8xf32> to vector<8x1xf32>
    %69 = vector.broadcast %68 : vector<8x1xf32> to vector<8x8xf32>
    %70 = arith.subf %66, %69 : vector<8x8xf32>
    %71 = math.exp %70 : vector<8x8xf32>
    %cst_28 = arith.constant dense<0.000000e+00> : vector<8xf32>
    %72 = vector.multi_reduction <add>, %71, %cst_28 [1] : vector<8x8xf32> to vector<8xf32>
    %73 = vector.shape_cast %72 : vector<8xf32> to vector<8x1xf32>
    %74 = tpu.reciprocal %73 {approx = true} : vector<8x1xf32> -> vector<8x1xf32>
    %75 = vector.broadcast %74 : vector<8x1xf32> to vector<8x8xf32>
    %76 = arith.mulf %71, %75 : vector<8x8xf32>
    %cst_29 = arith.constant dense<0.000000e+00> : vector<8x8xf32>
    %77 = tpu.matmul %76, %63, %cst_29 {dimension_numbers = #tpu.dot_dimension_numbers<[1], [0], [0], [1], [0, 0, 1, 1], [], []>} : vector<8x8xf32>, vector<8x8xf32>, vector<8x8xf32> -> vector<8x8xf32>
    %c0_30 = arith.constant 0 : index
    %c24 = arith.constant 24 : index
    %78 = vector.load %arg7[%c0_30, %c24] : memref<8x32xf32, #tpu.memory_space<vmem>>, vector<8x8xf32>
    tpu.vector_store %arg7[%c0_30, %c24], %77 {strides = array<i32>} : memref<8x32xf32, #tpu.memory_space<vmem>>, vector<8x8xf32>,
    %c0_31 = arith.constant 0 : index
    %c0_32 = arith.constant 0 : index
    %79 = vector.load %arg7[%c0_31, %c0_32] : memref<8x32xf32, #tpu.memory_space<vmem>>, vector<8x32xf32>
    %c0_33 = arith.constant 0 : index
    %c0_34 = arith.constant 0 : index
    %80 = vector.load %arg4[%c0_33, %c0_34] : memref<32x32xf32, #tpu.memory_space<vmem>>, vector<32x32xf32>
    %cst_35 = arith.constant dense<0.000000e+00> : vector<8x32xf32>
    %81 = tpu.matmul %79, %80, %cst_35 {dimension_numbers = #tpu.dot_dimension_numbers<[1], [0], [0], [1], [0, 0, 1, 1], [], []>} : vector<8x32xf32>, vector<32x32xf32>, vector<8x32xf32> -> vector<8x32xf32>
    %c0_36 = arith.constant 0 : index
    %c0_37 = arith.constant 0 : index
    %82 = vector.load %arg5[%c0_36, %c0_37] : memref<1x32xf32, #tpu.memory_space<vmem>>, vector<1x32xf32>
    %83 = vector.broadcast %82 : vector<1x32xf32> to vector<8x32xf32>
    %84 = arith.addf %81, %83 : vector<8x32xf32>
    %c0_38 = arith.constant 0 : index
    %c0_39 = arith.constant 0 : index
    %c0_40 = arith.constant 0 : index
    %85 = vector.load %arg6[%c0_38, %c0_39, %c0_40] : memref<1x8x32xf32, #tpu.memory_space<vmem>>, vector<1x8x32xf32>
    %86 = vector.shape_cast %85 : vector<1x8x32xf32> to vector<8x32xf32>
    %87 = vector.shape_cast %84 : vector<8x32xf32> to vector<1x8x32xf32>
    tpu.vector_store %arg6[%c0_38, %c0_39, %c0_40], %87 {strides = array<i32>} : memref<1x8x32xf32, #tpu.memory_space<vmem>>, vector<1x8x32xf32>,
    return
  }
  func.func @transform_0(%arg0: i32) -> (i32, i32, i32) {
    %c0_i32 = arith.constant 0 : i32
    %c0_i32_0 = arith.constant 0 : i32
    %c0_i32_1 = arith.constant 0 : i32
    return %arg0, %c0_i32, %c0_i32_0 : i32, i32, i32
  }
  func.func @transform_1(%arg0: i32) -> (i32, i32) {
    %c0_i32 = arith.constant 0 : i32
    %c0_i32_0 = arith.constant 0 : i32
    %c0_i32_1 = arith.constant 0 : i32
    return %c0_i32, %c0_i32_0 : i32, i32
  }
  func.func @transform_2(%arg0: i32) -> (i32, i32) {
    %c0_i32 = arith.constant 0 : i32
    %c0_i32_0 = arith.constant 0 : i32
    %c0_i32_1 = arith.constant 0 : i32
    return %c0_i32, %c0_i32_0 : i32, i32
  }
  func.func @transform_3(%arg0: i32) -> (i32, i32) {
    %c0_i32 = arith.constant 0 : i32
    %c0_i32_0 = arith.constant 0 : i32
    %c0_i32_1 = arith.constant 0 : i32
    return %c0_i32, %c0_i32_0 : i32, i32
  }
  func.func @transform_4(%arg0: i32) -> (i32, i32) {
    %c0_i32 = arith.constant 0 : i32
    %c0_i32_0 = arith.constant 0 : i32
    %c0_i32_1 = arith.constant 0 : i32
    return %c0_i32, %c0_i32_0 : i32, i32
  }
  func.func @transform_5(%arg0: i32) -> (i32, i32, i32) {
    %c0_i32 = arith.constant 0 : i32
    %c0_i32_0 = arith.constant 0 : i32
    %c0_i32_1 = arith.constant 0 : i32
    return %arg0, %c0_i32, %c0_i32_0 : i32, i32, i32
  }
}

</mosaic_0001>

<bundles_post_ra>
// kernel: tpu_custom_call.1
= control target key start
LH: loop header
LB: loop body
LE: loop exit
PB: predicated region body
PF: predicated region fallthrough
CT: control target
= control target key end

     0   :  { %10 = vsyncpa [#allocation4], 0  ;;  %s1905_s0 = inlined_call_operand.hbm [shape: f32[2,8,32], index: 0, kind: input, shape index: {}]   ;;  %s1906_s1 = inlined_call_operand.hbm [shape: f32[32,96], index: 1, kind: input, shape index: {}]   ;;  %s1907_s2 = inlined_call_operand.vmem [shape: f32[1,96], index: 2, kind: input, shape index: {}]   ;;  %s1908_s3 = inlined_call_operand.hbm [shape: f32[32,32], index: 3, kind: input, shape index: {}]   ;;  %s1909_s4 = inlined_call_operand.vmem [shape: f32[1,32], index: 4, kind: input, shape index: {}]   ;;  %s1910_s5 = inlined_call_operand.hbm [shape: f32[2,8,32], index: 5, kind: output, shape index: {}]  }
   0x1   :  { %12 = vsyncpa [#allocation4 + $0x1], 0 }
   0x2   :  { %13 = vsyncpa [#allocation7], 0 }
   0x3   :  { %14 = vsyncpa [#allocation5], 0 }
   0x4   :  { %16 = vsyncpa [#allocation5 + $0x1], 0  ;;  %s1650_s18 = smov 0   ;;  %s1652_s19 = smov 0  }
   0x5   :  { %s1654_s20 = smov 0   ;;  %s1656_s21 = smov 0  }
   0x6 LB: > { %s1671_s22 = sadd.s32 4294967295, %s1596_s21   ;;  %s1227_s23 = sadd.s32 4294967294, %s1596_s21   ;;  %s1596_s21 = sphi %s1656_s21, %s1932_s21   ;;  %s1592_s20 = sphi %s1654_s20, %s1931_s20   ;;  %s1588_s19 = sphi %s1652_s19, %s1930_s19   ;;  %s1584_s18 = sphi %s1650_s18, %s1929_s18  }
   0x7   : > { %p42_p0 = scmp.ne.s32.totalorder %s1588_s19, %s1584_s18  ;;  %p1911_p1 = scmp.eq.s32.totalorder %s1671_s22, 0 }
   0x8   : > { %p156_p3 = scmp.eq.s32.totalorder %s1227_s23, 1  ;;  %p1228_p5 = scmp.ge.s32.totalorder %s1596_s21, 1 }
   0x9   : > { %p1680_p4 = por %p1911_p1, %p42_p0  ;;  %p163_p7 = scmp.lt.s32.totalorder %s1596_s21, 3 }
   0xa   : > { %p1685_p6 = por %p156_p3, %p42_p0  ;;  %s1598_s27 = smov [#allocation6]  }
   0xb   : > { %s1915_s24 = scalar_select %p1680_p4, 1, 0 }
   0xc   : > { %s1916_s25 = scalar_select %p1685_p6, 1, 0 }
   0xd   : > { %p1690_p8 = pnand %p1228_p5, %p163_p7  ;;  %s175_s28 = sshll.u32 %s1598_s27, 4  ;;  %s176_s28 = int_to_ptr.vmem [resolvable:$true] %s175_s28 }
   0xe   : > { %s1599_s30 = smov [#allocation8]   ;;  %s1459_s7 = scalar_lea.vmem %s176_s28, 512 }
   0xf   : > { %s1917_s26 = scalar_select %p1690_p8, 1, 0 }
  0x10   : > { %p1359_p9 = pneg %p1690_p8  ;;  %s191_s6 = sshll.u32 %s1599_s30, 4  ;;  %s192_s6 = int_to_ptr.vmem [resolvable:$true] %s191_s6 }
  0x11   : > { %p1460_p13 = scmp.ne.s32.totalorder %s176_s28, %s1459_s7  ;;  %p1467_p5 = scmp.lt.s32.totalorder %s176_s28, %s176_s28 }
  0x12   : > { %p1699_p11 = pnand %p1359_p9, %p1911_p1  ;;  %p1468_p7 = scmp.lt.s32.totalorder %s1459_s7, %s1459_s7 }
  0x14   : > { %p1450_p12 = pneg %p1699_p11  ;;  %p1469_p10 = por %p1468_p7, %p1467_p5 }
  0x16   : > { %p1462_p0 = pnand %p1460_p13, %p1450_p12 }
  0x18   : > { %p1463_p3 = pneg %p1462_p0 }
  0x1a   : > { %p1470_p9 = pnand %p1469_p10, %p1463_p3 }
  0x1c   : > { %1473 = shalt.err (!%p1470_p9)
}
  0x1d   : > { %s1600_s8 = smov 128   ;;  %s1601_s9 = smov 8  }
  0x1e   : > { %1362 = dma.hbm_to_vmem [thread:$0]  (!%p1699_p11), %s1906_s1, 512, %s176_s28, [#allocation7], %s1600_s8, %s1600_s8, %s1601_s9  }
  0x1f   : > { %s1485_s12 = scalar_lea.vmem %s192_s6, 512  ;;  %p1493_p2 = scmp.lt.s32.totalorder %s192_s6, %s192_s6 }
  0x20   : > { %p1486_p1 = scmp.ne.s32.totalorder %s192_s6, %s1485_s12  ;;  %p1494_p6 = scmp.lt.s32.totalorder %s1485_s12, %s1485_s12 }
  0x22   : > { %p1488_p13 = pnand %p1486_p1, %p1450_p12  ;;  %p1495_p5 = por %p1494_p6, %p1493_p2 }
  0x24   : > { %p1489_p0 = pneg %p1488_p13 }
  0x26   : > { %p1496_p10 = pnand %p1495_p5, %p1489_p0 }
  0x28   : > { %1499 = shalt.err (!%p1496_p10)
}
  0x29   : > { %1365 = dma.hbm_to_vmem [thread:$0]  (!%p1699_p11), %s1908_s3, 512, %s192_s6, [#allocation7], %s1600_s8, %s1600_s8, %s1601_s9  }
  0x2a   : > { %s1722_s15 = sadd.s32 1, %s1596_s21   ;;  %s29_s16 = sadd.s32 1, %s1592_s20 }
  0x2b   : > { %s26_s17 = ssub.s32 %s1596_s21, %s1722_s15  ;;  %p36_p1 = scmp.ne.s32.totalorder %s1592_s20, %s1588_s19 }
  0x2c   : > { %p27_p2 = scmp.eq.s32.totalorder %s26_s17, 0  ;;  %p37_p6 = scmp.eq.s32.totalorder %s1596_s21, 0 }
  0x2d   : > { %p1919_p12 = scmp.eq.s32.totalorder %s1671_s22, 1  ;;  %p1376_p7 = scmp.lt.s32.totalorder %s1596_s21, 2 }
  0x2e   : > { %s1738_s27 = scalar_select %p27_p2, %s1592_s20, %s29_s16  }
  0x2f   : > { %p1732_p3 = por %p1919_p12, %p36_p1  ;;  %p38_p9 = por %p37_p6, %p36_p1 }
  0x30   : > { %s208_s28 = sand.u32 1, %s1592_s20   ;;  %s1233_s30 = sshll.u32 %s1596_s21, 7 }
  0x31   : > { %s1920_s23 = scalar_select %p1732_p3, 1, 0 }
  0x32   : > { %s1232_s29 = sshll.u32 %s208_s28, 3  ;;  %s1745_s8 = scalar_lea.hbm %s1905_s0, %s1233_s30 }
  0x33   : > { %s212_s9 = scalar_lea.vmem [#allocation3], %s1232_s29  ;;  %p1747_p11 = pnand %p1376_p7, %p38_p9 }
  0x34   : > { %s219_s10 = sshll.u32 %s212_s9, 4  ;;  %s209_s12 = scalar_lea.sflag [#allocation4], %s208_s28  ;;  %s220_s10 = int_to_ptr.vmem [resolvable:$true] %s219_s10 }
  0x35   : > { %s1500_s13 = scalar_lea.hbm %s1745_s8, 128  ;;  %p1502_p0 = pneg %p1747_p11 }
  0x36   : > { %p1501_p13 = scmp.ne.s32.totalorder %s1745_s8, %s1500_s13  ;;  %s1505_s17 = scalar_lea.hbm %s1905_s0, 256 }
  0x37   : > { %p1506_p1 = scmp.lt.s32.totalorder %s1745_s8, %s1905_s0  ;;  %p1507_p2 = scmp.lt.s32.totalorder %s1505_s17, %s1500_s13 }
  0x38   : > { %p1503_p5 = pnand %p1502_p0, %p1501_p13 }
  0x39   : > { %p1508_p6 = por %p1507_p2, %p1506_p1 }
  0x3a   : > { %p1504_p10 = pneg %p1503_p5 }
  0x3c   : > { %p1509_p12 = pnand %p1508_p6, %p1504_p10 }
  0x3e   : > { %1512 = shalt.err (!%p1509_p12)
}
  0x3f   : > { %s1513_s6 = scalar_lea.vmem %s220_s10, 128  ;;  %s1602_s28 = smov [#allocation3]  }
  0x40   : > { %p1514_p7 = scmp.ne.s32.totalorder %s220_s10, %s1513_s6  ;;  %s1518_s7 = sshll.u32 %s1602_s28, 4  ;;  %s1519_s7 = int_to_ptr.vmem [resolvable:$false] %s1518_s7 }
  0x41   : > { %s1520_s9 = scalar_lea.vmem %s1519_s7, 256  ;;  %p1521_p13 = scmp.lt.s32.totalorder %s220_s10, %s1519_s7 }
  0x42   : > { %p1516_p9 = pnand %p1514_p7, %p1502_p0  ;;  %p1522_p5 = scmp.lt.s32.totalorder %s1520_s9, %s1513_s6 }
  0x44   : > { %p1517_p3 = pneg %p1516_p9  ;;  %p1523_p4 = por %p1522_p5, %p1521_p13 }
  0x46   : > { %p1524_p8 = pnand %p1523_p4, %p1517_p3 }
  0x48   : > { %1527 = shalt.err (!%p1524_p8)
}
  0x49   : > { %1369 = dma.hbm_to_vmem [thread:$0]  (!%p1747_p11), %s1745_s8, 128, %s220_s10, %s209_s12  }
  0x4a   : > { %p1922_p10 = scmp.ne.s32.totalorder %s1917_s26, 0 }
  0x4b   : > { %s1768_s13 = sand.u32 (!%p1922_p10), 1, %s1588_s19   ;;  %p1923_p4 = scmp.ne.s32.totalorder (!%p1922_p10), %s1915_s24, 0 }
  0x4c   : > { %228 = sbr.rel (%p1922_p10) target bundleno = 1995 (0x7cb), region = 40  ;;  %s1235_s14 = sshll.u32 (!%p1922_p10), %s1768_s13, 3 }
  0x4d   : > { %s231_s16 = scalar_lea.sflag (!%p1922_p10), [#allocation4], %s1768_s13  ;;  %s234_s17 = scalar_lea.vmem (!%p1922_p10), [#allocation3], %s1235_s14 }
  0x51   : > { %1571 = dma.done.wait (%p1923_p4), %s231_s16, 128  }
  0x52   : > { %1573 = vsyncadd (%p1923_p4), %s231_s16, 4294967168  ;;  %p1924_p8 = scmp.eq.s32.totalorder %s1671_s22, 0 }
  0x54   : > { %1575 = dma.done.wait (%p1924_p8), [#allocation7], 1024   ;;  %p1925_p3 = pmov %p1924_p8 }
  0x55   : > { %v1603_v0 = vmov 0.0   ;;  %vm1604_vm0 = vmmov 0   ;;  %v273_v1 = vld [vmem:[#allocation6 + $0x18] sm:$0xff]  ;;  %v272_v2 = vld [vmem:[#allocation6 + $0x10] sm:$0xff]  ;;  %v271_v3 = vld [vmem:[#allocation6 + $0x8] sm:$0xff]  ;;  %vm281_vm1 = vcmask 261120  }
  0x56   : > { %1577 = vsyncadd (%p1925_p3), [#allocation7], 4294966272  ;;  %1285 = vmatprep.subr.mxu0 %v1603_v0  ;;  %1293 = vmatprep.mubr.msk.f32.mxu0 %vm1604_vm0, %v1603_v0  ;;  %v270_v4 = vld [vmem:[#allocation6] sm:$0xff]  ;;  %v269_v5 = vld [vmem:[%s234_s17] sm:$0xff]  ;;  %s1605_s8 = smov 64   ;;  %s1606_s10 = smov 96  }
  0x57   : > { %1296 = vmatprep.subr.mxu1 %v1603_v0  ;;  %1298 = vmatprep.mubr.msk.f32.mxu1 %vm1604_vm0, %v1603_v0  ;;  %v1239_v6 = vld [vmem:[%s1907_s2] ss:$0 sm:$0xff]  ;;  %s1607_s11 = smov 88   ;;  %s1608_s12 = smov 120   ;;  %vm358_vm2 = vcmask 64512   ;;  %vm692_vm3 = vcmask 130112  }
  0x58   : > { %1286 = vmatpush3.msra.mxu0 %v273_v1  ;;  %s1609_s30 = smov 80   ;;  %s1610_s29 = smov 72   ;;  %vm864_vm4 = vcmask 195712   ;;  %vm1036_vm5 = vcmask 261312  }
  0x59   : > { %1287 = vmatprep.subr.mxu0 %v1603_v0  ;;  %s1611_s6 = smov 112   ;;  %s1612_s28 = smov 104  }
  0x5a   : > { %1288 = vmatpush3.msra.mxu0 %v272_v2  ;;  %s1613_s7 = smov 56   ;;  %s1614_s9 = smov 48  }
  0x5b   : > { %1289 = vmatprep.subr.mxu0 %v1603_v0  ;;  %s1615_s16 = smov 40   ;;  %s1616_s17 = smov 8  }
  0x5c   : > { %1290 = vmatpush3.msra.mxu0 %v271_v3  ;;  %s1617_s24 = smov 16   ;;  %s1618_s26 = smov 24  }
  0x5d   : > { %1291 = vmatprep.subr.mxu0 %v1603_v0  ;;  %p1926_p0 = scmp.ne.s32.totalorder %s1920_s23, 0 }
  0x5e   : > { %1292 = vmatpush3.msra.mxu0 %v270_v4 }
  0x5f   : > { %1294 = vmatmul.mubr.msk.f32.vlgmr.msra.gmra.mxu0 %vm281_vm1, %v269_v5  ;;  %1316 = vmatprep.subr.mxu0 %v1603_v0 }
  0x60   : > { %1318 = vmatprep.mubr.msk.f32.mxu0 %vm1604_vm0, %v1603_v0 }
 0x11f   : > { %v351_v7 = vpop.f32.mrf.mxu0 }
 0x120   : > { %v1798_v8 = vadd.f32 %v1239_v6, %v351_v7 }
 0x121   : > { %v1295_v9 = vpop.f32.mrf.mxu0 }
 0x122   : > { %445 = vrot.lane.b32.xlu1 %v1798_v8, %s1605_s8  ;;  %356 = vrot.lane.b32.xlu0 %v1798_v8, %s1606_s10  ;;  %v1041_v9 = vld [vmem:[#allocation8 + $0x10] sm:$0xff] }
 0x126   : > { %524 = vrot.lane.b32.xlu1 %v1798_v8, %s1607_s11  ;;  %s1256_s11 = sshll.u32 %s1671_s22, 7  ;;  %s1619_s22 = smov [#allocation9]  }
 0x12a   : > { %522 = vrot.lane.b32.xlu1 %v1798_v8, %s1608_s12  ;;  %s268_s12 = scalar_lea.vmem [#allocation9], %s1235_s14  ;;  %s1532_s14 = sshll.u32 %s1619_s22, 4  ;;  %s1533_s14 = int_to_ptr.vmem [resolvable:$false] %s1532_s14 }
 0x12e   : > { %696 = vrot.lane.b32.xlu1 %v1798_v8, %s1609_s30  ;;  %s1138_s30 = sshll.u32 %s268_s12, 4  ;;  %s1139_s30 = int_to_ptr.vmem [resolvable:$true] %s1138_s30 }
 0x12f   : > { %p1535_p6 = scmp.lt.s32.totalorder %s1139_s30, %s1533_s14 }
 0x194   : > { %v446_v10 = vpop.permute.xlu1 %445  ;;  %v357_v11 = vpop.permute.xlu0 %356 }
 0x195   : > { %1297 = vmatpush3.xpose.msk.msra.mxu1 %vm358_vm2, %v357_v11 }
 0x196   : > { %1301 = vmatprep.subr.mxu1 %v1603_v0 }
 0x198   : > { %v525_v12 = vpop.permute.xlu1 %524  ;;  %1299 = vmatmul.mubr.msk.f32.vlgmr.msra.gmra.mxu1 %vm358_vm2, %v1798_v8 }
 0x199   : > { %1302 = vmatpush3.msra.mxu1 %v446_v10  ;;  %1303 = vmatprep.mubr.msk.f32.mxu1 %vm1604_vm0, %v1603_v0  ;;  %v1040_v10 = vld [vmem:[#allocation8 + $0x8] sm:$0xff] }
 0x19a   : > { %1306 = vmatprep.subr.mxu1 %v1603_v0 }
 0x19c   : > { %v523_v13 = vpop.permute.xlu1 %522 }
 0x1a0   : > { %v697_v14 = vpop.permute.xlu1 %696 }
 0x1a1   : > { %1317 = vmatpush3.xpose.msk.msra.mxu0 %vm358_vm2, %v697_v14 }
 0x1a2   : > { %1326 = vmatprep.subr.mxu0 %v1603_v0 }
 0x258   : > { %v429_v15 = vpop.f32.mrf.mxu1 }
 0x259   : > { %v433_v16 = vmul.f32 0.35355338, %v429_v15 }
 0x25a   : > { %v1300_v17 = vpop.f32.mrf.mxu1 }
 0x25b   : > { %v434_v18 = vsel %vm358_vm2, %v433_v16, -inf }
 0x25c   : > { %435 = vmax.xlane.f32.xlu0 %v434_v18 }
 0x272   : > { %868 = vrot.lane.b32.xlu0 %v1798_v8, %s1610_s29 }
 0x2e5   : > { %v436_v19 = vpop.xlane.xlu0 %435 }
 0x2e6   : > { %v437_v20 = vsub.f32 %v433_v16, %v436_v19 }
 0x2e8   : > { %v438_v21 = vmul.f32 1.442695, %v437_v20 }
 0x2e9   : > { %v869_v26 = vpop.permute.xlu0 %868 }
 0x2ea   : > { %1432 = vpow2.f32 %v438_v21  ;;  %v1253_v21 = vld [vmem:[%s1909_s4] ss:$0 sm:$0xff] }
 0x2f7   : > { %v1433_v22 = vpop.eup %1432 }
 0x2f8   : > { %v440_v23 = vsel %vm358_vm2, %v1433_v22, 0.0 }
 0x2f9   : > { %441 = vadd.xlane.f32.xlu1 %v440_v23 }
 0x30a   : > { %694 = vrot.lane.b32.xlu1 %v1798_v8, %s1611_s6 }
 0x30e   : > { %866 = vrot.lane.b32.xlu1 %v1798_v8, %s1612_s28  ;;  %s1867_s28 = scalar_lea.hbm %s1910_s5, %s1256_s11 }
 0x382   : > { %v442_v24 = vpop.xlane.xlu1 %441 }
 0x383   : > { %1434 = vrcp.f32 %v442_v24 }
 0x386   : > { %v695_v25 = vpop.permute.xlu1 %694 }
 0x387   : > { %1319 = vmatmul.mubr.msk.f32.vlgmr.msra.gmra.mxu0 %vm358_vm2, %v695_v25 }
 0x388   : > { %1327 = vmatpush3.xpose.msk.msra.mxu0 %vm358_vm2, %v869_v26  ;;  %1328 = vmatprep.mubr.msk.f32.mxu0 %vm1604_vm0, %v1603_v0 }
 0x389   : > { %1336 = vmatprep.subr.mxu0 %v1603_v0 }
 0x38a   : > { %v867_v27 = vpop.permute.xlu1 %866 }
 0x38b   : > { %1329 = vmatmul.mubr.msk.f32.vlgmr.msra.gmra.mxu0 %vm358_vm2, %v867_v27 }
 0x38c   : > { %1344 = vmatprep.mubr.msk.f32.mxu0 %vm1604_vm0, %v1603_v0 }
 0x390   : > { %v1435_v28 = vpop.eup %1434 }
 0x391   : > { %v444_v29 = vmul.f32 %v1435_v28, %v1433_v22 }
 0x393   : > { %1304 = vmatmul.mubr.msk.f32.vlgmr.msra.gmra.mxu1 %vm358_vm2, %v444_v29 }
 0x394   : > { %1307 = vmatpush3.xpose.msk.msra.mxu1 %vm358_vm2, %v525_v12  ;;  %1308 = vmatprep.mubr.msk.f32.mxu1 %vm1604_vm0, %v1603_v0  ;;  %v1039_v12 = vld [vmem:[#allocation8] sm:$0xff] }
 0x395   : > { %1311 = vmatprep.subr.mxu1 %v1603_v0 }
 0x397   : > { %1309 = vmatmul.mubr.msk.f32.vlgmr.msra.gmra.mxu1 %vm358_vm2, %v523_v13 }
 0x398   : > { %1313 = vmatprep.mubr.msk.f32.mxu1 %vm1604_vm0, %v1603_v0 }
 0x447   : > { %v768_v30 = vpop.f32.mrf.mxu0 }
 0x448   : > { %v772_v31 = vmul.f32 0.35355338, %v768_v30 }
 0x449   : > { %v1320_v32 = vpop.f32.mrf.mxu0 }
 0x44a   : > { %v773_v33 = vsel %vm358_vm2, %v772_v31, -inf }
 0x44b   : > { %774 = vmax.xlane.f32.xlu0 %v773_v33  ;;  %v940_v34 = vpop.f32.mrf.mxu0 }
 0x44c   : > { %v944_v41 = vmul.f32 0.35355338, %v940_v34 }
 0x44d   : > { %v1330_v35 = vpop.f32.mrf.mxu0 }
 0x44e   : > { %v945_v43 = vsel %vm358_vm2, %v944_v41, -inf }
 0x453   : > { %v517_v36 = vpop.f32.mrf.mxu1 }
 0x454   : > { %521 = vst.msk [vmem:[#allocation2] sm:$0xff] %vm358_vm2, %v517_v36 }
 0x455   : > { %v1305_v37 = vpop.f32.mrf.mxu1 }
 0x457   : > { %v596_v38 = vpop.f32.mrf.mxu1 }
 0x458   : > { %v600_v39 = vmul.f32 0.35355338, %v596_v38 }
 0x459   : > { %v1310_v40 = vpop.f32.mrf.mxu1 }
 0x45a   : > { %v601_v42 = vsel %vm358_vm2, %v600_v39, -inf }
 0x45b   : > { %602 = vmax.xlane.f32.xlu1 %v601_v42 }
 0x45f   : > { %946 = vmax.xlane.f32.xlu1 %v945_v43 }
 0x4d4   : > { %v775_v44 = vpop.xlane.xlu0 %774 }
 0x4d5   : > { %v776_v45 = vsub.f32 %v772_v31, %v775_v44 }
 0x4d7   : > { %v777_v46 = vmul.f32 1.442695, %v776_v45 }
 0x4d9   : > { %1436 = vpow2.f32 %v777_v46 }
 0x4e4   : > { %v603_v47 = vpop.xlane.xlu1 %602 }
 0x4e5   : > { %v604_v55 = vsub.f32 %v600_v39, %v603_v47 }
 0x4e6   : > { %v1437_v48 = vpop.eup %1436 }
 0x4e7   : > { %v779_v49 = vsel %vm358_vm2, %v1437_v48, 0.0  ;;  %v605_v56 = vmul.f32 1.442695, %v604_v55 }
 0x4e8   : > { %780 = vadd.xlane.f32.xlu1 %v779_v49  ;;  %v947_v50 = vpop.xlane.xlu1 %946 }
 0x4e9   : > { %v948_v51 = vsub.f32 %v944_v41, %v947_v50 }
 0x4eb   : > { %v949_v52 = vmul.f32 1.442695, %v948_v51 }
 0x4ed   : > { %1438 = vpow2.f32 %v949_v52 }
 0x4ee   : > { %1440 = vpow2.f32 %v605_v56 }
 0x4f9   : > { %612 = vrot.lane.b32.xlu1 %v1798_v8, %s1613_s7  ;;  %s1125_s7 = scalar_lea.sflag [#allocation5], %s1768_s13 }
 0x4fa   : > { %v1439_v53 = vpop.eup %1438 }
 0x4fb   : > { %v951_v54 = vsel %vm358_vm2, %v1439_v53, 0.0  ;;  %v1441_v57 = vpop.eup %1440 }
 0x4fc   : > { %952 = vadd.xlane.f32.xlu0 %v951_v54  ;;  %v607_v58 = vsel %vm358_vm2, %v1441_v57, 0.0 }
 0x512   : > { %784 = vrot.lane.b32.xlu0 %v1798_v8, %s1614_s9  ;;  %s1528_s9 = scalar_lea.vmem %s1139_s30, 128 }
 0x513   : > { %p1529_p11 = scmp.ne.s32.totalorder %s1139_s30, %s1528_s9 }
 0x515   : > { %p1530_p1 = pnand %p1529_p11, %p1926_p0 }
 0x517   : > { %p1531_p2 = pneg %p1530_p1 }
 0x51d   : > { %608 = vadd.xlane.f32.xlu1 %v607_v58 }
 0x52e   : > { %956 = vrot.lane.b32.xlu1 %v1798_v8, %s1615_s16  ;;  %v1042_v8 = vld [vmem:[#allocation8 + $0x18] sm:$0xff]  ;;  %s1534_s16 = scalar_lea.vmem %s1533_s14, 256 }
 0x52f   : > { %1337 = vmatpush3.msra.mxu0 %v1042_v8  ;;  %p1536_p12 = scmp.lt.s32.totalorder %s1534_s16, %s1528_s9 }
 0x530   : > { %1338 = vmatprep.subr.mxu0 %v1603_v0 }
 0x531   : > { %1339 = vmatpush3.msra.mxu0 %v1041_v9  ;;  %p1537_p7 = por %p1536_p12, %p1535_p6 }
 0x532   : > { %1340 = vmatprep.subr.mxu0 %v1603_v0 }
 0x533   : > { %1341 = vmatpush3.msra.mxu0 %v1040_v10  ;;  %p1538_p9 = pnand %p1537_p7, %p1531_p2 }
 0x534   : > { %1342 = vmatprep.subr.mxu0 %v1603_v0 }
 0x535   : > { %1343 = vmatpush3.msra.mxu0 %v1039_v12 }
 0x571   : > { %v781_v59 = vpop.xlane.xlu1 %780 }
 0x575   : > { %v613_v60 = vpop.permute.xlu1 %612 }
 0x576   : > { %1312 = vmatpush3.msra.mxu1 %v613_v60 }
 0x577   : > { %1321 = vmatprep.subr.mxu1 %v1603_v0 }
 0x585   : > { %v953_v62 = vpop.xlane.xlu0 %952 }
 0x589   : > { %v785_v3 = vpop.permute.xlu0 %784 }
 0x5a6   : > { %v609_v61 = vpop.xlane.xlu1 %608 }
 0x5a7   : > { %1442 = vrcp.f32 %v609_v61 }
 0x5a8   : > { %1444 = vrcp.f32 %v781_v59 }
 0x5a9   : > { %1446 = vrcp.f32 %v953_v62 }
 0x5aa   : > { %v957_v6 = vpop.permute.xlu1 %956 }
 0x5b4   : > { %v1443_v63 = vpop.eup %1442 }
 0x5b5   : > { %v611_v1 = vmul.f32 %v1443_v63, %v1441_v57  ;;  %v1445_v2 = vpop.eup %1444 }
 0x5b6   : > { %v783_v4 = vmul.f32 %v1445_v2, %v1437_v48  ;;  %v1447_v5 = vpop.eup %1446 }
 0x5b7   : > { %1314 = vmatmul.mubr.msk.f32.vlgmr.msra.gmra.mxu1 %vm358_vm2, %v611_v1  ;;  %v955_v7 = vmul.f32 %v1447_v5, %v1439_v53 }
 0x5b8   : > { %1322 = vmatpush3.msra.mxu1 %v785_v3  ;;  %1323 = vmatprep.mubr.msk.f32.mxu1 %vm1604_vm0, %v1603_v0 }
 0x5b9   : > { %1331 = vmatprep.subr.mxu1 %v1603_v0 }
 0x5bb   : > { %1324 = vmatmul.mubr.msk.f32.vlgmr.msra.gmra.mxu1 %vm358_vm2, %v783_v4 }
 0x5bc   : > { %1332 = vmatpush3.msra.mxu1 %v957_v6  ;;  %1333 = vmatprep.mubr.msk.f32.mxu1 %vm1604_vm0, %v1603_v0 }
 0x5bf   : > { %1334 = vmatmul.mubr.msk.f32.vlgmr.msra.gmra.mxu1 %vm358_vm2, %v955_v7 }
 0x677   : > { %v684_v11 = vpop.f32.mrf.mxu1 }
 0x678   : > { %689 = vrot.lane.b32.xlu1 %v684_v11, %s1616_s17 }
 0x679   : > { %v1315_v13 = vpop.f32.mrf.mxu1 }
 0x67b   : > { %v856_v14 = vpop.f32.mrf.mxu1 }
 0x67c   : > { %861 = vrot.lane.b32.xlu0 %v856_v14, %s1617_s24 }
 0x67d   : > { %v1325_v15 = vpop.f32.mrf.mxu1 }
 0x67f   : > { %v1028_v16 = vpop.f32.mrf.mxu1 }
 0x680   : > { %1033 = vrot.lane.b32.xlu1 %v1028_v16, %s1618_s26 }
 0x681   : > { %v1335_v17 = vpop.f32.mrf.mxu1 }
 0x6ea   : > { %v690_v18 = vpop.permute.xlu1 %689 }
 0x6eb   : > { %693 = vst.msk [vmem:[#allocation2] sm:$0xff] %vm692_vm3, %v690_v18 }
 0x6ee   : > { %v862_v19 = vpop.permute.xlu0 %861 }
 0x6ef   : > { %865 = vst.msk [vmem:[#allocation2] sm:$0xff] %vm864_vm4, %v862_v19 }
 0x6f2   : > { %v1034_v0 = vpop.permute.xlu1 %1033 }
 0x6f3   : > { %1037 = vst.msk [vmem:[#allocation2] sm:$0xff] %vm1036_vm5, %v1034_v0 }
 0x6fa   : > { %v1038_v20 = vld [vmem:[#allocation2] sm:$0xff] }
 0x6fb   : > { %1345 = vmatmul.mubr.msk.f32.vlgmr.msra.gmra.mxu0 %vm281_vm1, %v1038_v20 }
 0x7bb   : > { %v1119_v22 = vpop.f32.mrf.mxu0 }
 0x7bc   : > { %v1120_v23 = vadd.f32 %v1253_v21, %v1119_v22 }
 0x7bd   : > { %v1346_v24 = vpop.f32.mrf.mxu0 }
 0x7be   : > { %1123 = vst.msk [vmem:[%s268_s12] sm:$0xff] %vm281_vm1, %v1120_v23 }
 0x7bf   : > { %1541 = shalt.err (!%p1538_p9)
}
 0x7c0   : > { %s1542_s17 = scalar_lea.hbm %s1867_s28, 128  ;;  %s1546_s26 = scalar_lea.hbm %s1910_s5, 256 }
 0x7c1   : > { %p1543_p13 = scmp.ne.s32.totalorder %s1867_s28, %s1542_s17  ;;  %p1547_p4 = scmp.lt.s32.totalorder %s1867_s28, %s1910_s5 }
 0x7c2   : > { %p1548_p8 = scmp.lt.s32.totalorder %s1546_s26, %s1542_s17 }
 0x7c3   : > { %p1544_p5 = pnand %p1543_p13, %p1926_p0 }
 0x7c4   : > { %p1549_p3 = por %p1548_p8, %p1547_p4 }
 0x7c5   : > { %p1545_p10 = pneg %p1544_p5 }
 0x7c7   : > { %p1550_p11 = pnand %p1549_p3, %p1545_p10 }
 0x7c9   : > { %1553 = shalt.err (!%p1550_p11)
}
 0x7ca   : > { %1357 = dma.vmem_to_hbm [thread:$0]  (%p1926_p0), %s1139_s30, 128, %s1867_s28, %s1125_s7  }
 0x7cb PF: > { %s1150_s11 = sand.u32 1, %s1584_s18   ;;  %p1927_p1 = scmp.ne.s32.totalorder %s1916_s25, 0 }
 0x7cc   : > { %p1928_p2 = scmp.ge.s32.totalorder %s1596_s21, 2  ;;  %s1151_s12 = scalar_lea.sflag [#allocation5], %s1150_s11 }
 0x7ce   : > { %p1371_p6 = pnand %p1928_p2, %p1927_p1 }
 0x7d0   : > { %p1372_p12 = pneg %p1371_p6 }
 0x7d2   : > { %1579 = dma.done.wait (%p1372_p12), %s1151_s12, 128  }
 0x7d3   : > { %1581 = vsyncadd (%p1372_p12), %s1151_s12, 4294967168  ;;  %p19_p7 = scmp.ge.s32.totalorder %s1722_s15, 4   ;;  %s1929_s18 = smov %s1588_s19 }
 0x7d4   : > { %s1930_s19 = smov %s1592_s20  ;;  %s1931_s20 = smov %s1738_s27 }
 0x7d5   : > { %s1932_s21 = smov %s1722_s15  ;;  %21 = sbr.rel (!%p19_p7) target bundleno = 6 (0x6), region = 93 }
 0x7da   :  { %1156 = vsyncpa [#allocation4], 1 }
 0x7db   :  { %1158 = vsyncpa [#allocation4 + $0x1], 1 }
 0x7dc   :  { %1159 = vsyncpa [#allocation7], 1 }
 0x7dd   :  { %1160 = vsyncpa [#allocation5], 1 }
 0x7de   :  { %1162 = vsyncpa [#allocation5 + $0x1], 1 }

</bundles_post_ra>
